<compile_context>
chip_gen: v7x
topology: tpu7x:2x2x1
jax: 0.10.0
libtpu: 0.0.40
codegen_flags: <defaults>
</compile_context>

<pallas_src>
import functools

import jax
import jax.numpy as jnp
from jax.experimental import pallas as pl
from jax.experimental.pallas import tpu as pltpu


def _round_up(x, mult):
    return ((x + mult - 1) // mult) * mult


def _xbm_kernel(margin, n_total, m_total, bn, tm,
                emb_ref, lab_col_ref, bank_ref, lab_row_ref, out_ref):
    """Grid step (i, j): query row-block i vs memory-bank tile j."""
    i = pl.program_id(0)
    j = pl.program_id(1)

    # The (bn, 128) output block is resident across the bank axis -> init at j==0.
    @pl.when(j == 0)
    def _():
        out_ref[...] = jnp.zeros_like(out_ref)

    # (bn, tm) similarity tile on the MXU. Contract D (dim 1 of both operands)
    # so the bank tile stays in its natural (tm, D) layout (no wrapper transpose),
    # inputs keep their dtype (bf16 fine), accumulation is f32.
    sim = jax.lax.dot_general(
        emb_ref[...], bank_ref[...],
        dimension_numbers=(((1,), (1,)), ((), ())),
        preferred_element_type=jnp.float32)

    same = lab_col_ref[...] == lab_row_ref[...]          # (bn,1)==(1,tm) -> (bn,tm)

    eps = jnp.float32(1e-5)
    one = jnp.float32(1.0)
    zero = jnp.float32(0.0)
    margin_f = jnp.float32(margin)

    # Fused pos/neg select: positives contribute (1 - sim) when sim < 1 - eps,
    # negatives contribute sim when sim > margin.
    contrib = jnp.where(
        same,
        jnp.where(sim < one - eps, one - sim, zero),
        jnp.where(sim > margin_f, sim, zero))

    # Mask padded query rows / padded bank columns exactly.
    row_ids = i * bn + jax.lax.broadcasted_iota(jnp.int32, (bn, tm), 0)
    col_ids = j * tm + jax.lax.broadcasted_iota(jnp.int32, (bn, tm), 1)
    valid = (row_ids < n_total) & (col_ids < m_total)
    contrib = jnp.where(valid, contrib, zero)

    # Fold (bn, tm) into the resident (bn, 128) accumulator with vreg-aligned
    # 128-lane slices: pure VPU adds, no XLU reduce on the per-step path.
    folded = contrib[:, 0:128]
    for t in range(1, tm // 128):
        folded = folded + contrib[:, t * 128:(t + 1) * 128]
    out_ref[...] += folded


def xbm_loss(embeddings, labels, ref_embeddings=None, ref_labels=None, *,
             margin=0.5, hierarchy_level=0,
             block_rows=256, block_cols=512,
             vmem_limit_bytes=64 * 1024 * 1024):
    """Pallas implementation of XBMLoss.forward."""
    if ref_embeddings is None:
        ref_embeddings = embeddings
    if ref_labels is None:
        ref_labels = labels
    if hierarchy_level is not None:
        labels = labels[:, hierarchy_level]
        ref_labels = ref_labels[:, hierarchy_level]

    n, d = embeddings.shape
    m, d2 = ref_embeddings.shape
    assert d == d2, "embedding dims must match"

    # MXU / lane-friendly tile sizes (shrink for tiny shapes, pad up otherwise).
    bn = block_rows if n >= block_rows else _round_up(n, 8)
    tm = block_cols if m >= block_cols else _round_up(m, 128)
    n_pad = _round_up(n, bn)
    m_pad = _round_up(m, tm)
    d_pad = _round_up(d, 128)

    # Zero-padding; inputs keep their dtype (feed bf16 for real XBM bank sizes).
    emb = jnp.pad(embeddings, ((0, n_pad - n), (0, d_pad - d)))
    bank = jnp.pad(ref_embeddings, ((0, m_pad - m), (0, d_pad - d)))
    lab_col = jnp.pad(labels.astype(jnp.int32), (0, n_pad - n)).reshape(n_pad, 1)
    lab_row = jnp.pad(ref_labels.astype(jnp.int32), (0, m_pad - m)).reshape(1, m_pad)

    n_blocks = n_pad // bn
    m_blocks = m_pad // tm

    kernel = functools.partial(_xbm_kernel, float(margin), n, m, bn, tm)

    partial = pl.pallas_call(
        kernel,
        out_shape=jax.ShapeDtypeStruct((n_pad, 128), jnp.float32),
        grid_spec=pltpu.PrefetchScalarGridSpec(
            num_scalar_prefetch=0,
            grid=(n_blocks, m_blocks),            # bank (reduction) axis last
            in_specs=[
                pl.BlockSpec((bn, d_pad), lambda i, j: (i, 0)),   # query rows
                pl.BlockSpec((bn, 1), lambda i, j: (i, 0)),       # query labels
                pl.BlockSpec((tm, d_pad), lambda i, j: (j, 0)),   # bank tile (M,D)
                pl.BlockSpec((1, tm), lambda i, j: (0, j)),       # bank labels tile
            ],
            out_specs=pl.BlockSpec((bn, 128), lambda i, j: (i, 0)),
        ),
        compiler_params=pltpu.CompilerParams(
            dimension_semantics=("parallel", "arbitrary"),
            vmem_limit_bytes=vmem_limit_bytes),
    )(emb, lab_col, bank, lab_row)

    # Tiny final reduce + normalization in JAX.
    return jnp.sum(partial) / jnp.float32(n)


def xbm_loss_ref(embeddings, labels, ref_embeddings, ref_labels,
                 *, margin=0.5, hierarchy_level=0):
    """Pure-JAX reference mirroring the PyTorch module."""
    labels = labels[:, hierarchy_level]
    ref_labels = ref_labels[:, hierarchy_level]
    sim = embeddings.astype(jnp.float32) @ ref_embeddings.astype(jnp.float32).T
    same = labels[:, None] == ref_labels[None, :]
    pos_mask = same & (sim < 1.0 - 1e-5)
    neg_mask = (~same) & (sim > margin)
    loss = jnp.sum(jnp.where(pos_mask, 1.0 - sim, 0.0)) + jnp.sum(jnp.where(neg_mask, sim, 0.0))
    return loss / embeddings.shape[0]


if __name__ == "__main__":
    key = jax.random.PRNGKey(0)
    k_e, k_r, k_l, k_rl = jax.random.split(key, 4)

    N, M, D, L = 16, 32, 32, 3  # batch, memory-bank size, embedding dim, label depth

    embeddings = jax.random.normal(k_e, (N, D), dtype=jnp.float32)
    embeddings = embeddings / jnp.linalg.norm(embeddings, axis=-1, keepdims=True)
    ref_embeddings = jax.random.normal(k_r, (M, D), dtype=jnp.float32)
    ref_embeddings = ref_embeddings / jnp.linalg.norm(ref_embeddings, axis=-1, keepdims=True)

    labels = jax.random.randint(k_l, (N, L), 0, 4, dtype=jnp.int32)
    ref_labels = jax.random.randint(k_rl, (M, L), 0, 4, dtype=jnp.int32)

    loss = xbm_loss(embeddings, labels, ref_embeddings, ref_labels,
                    margin=0.5, hierarchy_level=0)
    loss = jax.block_until_ready(loss)

    loss_ref = xbm_loss_ref(embeddings, labels, ref_embeddings, ref_labels,
                            margin=0.5, hierarchy_level=0)

    assert jnp.allclose(loss, loss_ref, rtol=1e-4, atol=1e-4), (loss, loss_ref)
    print("KERNEL_OK")
</pallas_src>

<mosaic_0001>
module attributes {stable_mosaic.version = 11 : i64} {
  func.func @_xbm_kernel(%arg0: i32, %arg1: i32, %arg2: memref<16x128xf32, #tpu.memory_space<vmem>>, %arg3: memref<16x1xi32, #tpu.memory_space<vmem>>, %arg4: memref<128x128xf32, #tpu.memory_space<vmem>>, %arg5: memref<1x128xi32, #tpu.memory_space<vmem>>, %arg6: memref<16x128xf32, #tpu.memory_space<vmem>>) attributes {dimension_semantics = [#tpu.dimension_semantics<parallel>, #tpu.dimension_semantics<arbitrary>], iteration_bounds = array<i64: 1, 1>, scalar_prefetch = 0 : i64, scratch_operands = 0 : i64, tpu.core_type = #tpu.core_type<tc>, window_params = [{transform_indices = @transform_0, window_bounds = array<i64: 16, 128>}, {transform_indices = @transform_1, window_bounds = array<i64: 16, 1>}, {transform_indices = @transform_2, window_bounds = array<i64: 128, 128>}, {transform_indices = @transform_3, window_bounds = array<i64: 1, 128>}, {transform_indices = @transform_4, window_bounds = array<i64: 16, 128>}]} {
    %c0_i32 = arith.constant 0 : i32
    %0 = arith.cmpi eq, %arg1, %c0_i32 : i32
    %1 = arith.extui %0 : i1 to i32
    %c0_i32_0 = arith.constant 0 : i32
    %2 = arith.cmpi ne, %1, %c0_i32_0 : i32
    scf.if %2 {
      %cst_20 = arith.constant 0.000000e+00 : f32
      %41 = vector.broadcast %cst_20 : f32 to vector<16x128xf32>
      %c0_21 = arith.constant 0 : index
      %c0_22 = arith.constant 0 : index
      %42 = vector.load %arg6[%c0_21, %c0_22] : memref<16x128xf32, #tpu.memory_space<vmem>>, vector<16x128xf32>
      tpu.vector_store %arg6[%c0_21, %c0_22], %41 {strides = array<i32>} : memref<16x128xf32, #tpu.memory_space<vmem>>, vector<16x128xf32>,
    } else {
    }
    %c0 = arith.constant 0 : index
    %c0_1 = arith.constant 0 : index
    %3 = vector.load %arg2[%c0, %c0_1] : memref<16x128xf32, #tpu.memory_space<vmem>>, vector<16x128xf32>
    %c0_2 = arith.constant 0 : index
    %c0_3 = arith.constant 0 : index
    %4 = vector.load %arg4[%c0_2, %c0_3] : memref<128x128xf32, #tpu.memory_space<vmem>>, vector<128x128xf32>
    %cst = arith.constant dense<0.000000e+00> : vector<16x128xf32>
    %5 = tpu.matmul %3, %4, %cst {dimension_numbers = #tpu.dot_dimension_numbers<[1], [1], [0], [0], [0, 0, 1, 0], [], []>} : vector<16x128xf32>, vector<128x128xf32>, vector<16x128xf32> -> vector<16x128xf32>
    %c0_4 = arith.constant 0 : index
    %c0_5 = arith.constant 0 : index
    %6 = vector.load %arg3[%c0_4, %c0_5] : memref<16x1xi32, #tpu.memory_space<vmem>>, vector<16x1xi32>
    %c0_6 = arith.constant 0 : index
    %c0_7 = arith.constant 0 : index
    %7 = vector.load %arg5[%c0_6, %c0_7] : memref<1x128xi32, #tpu.memory_space<vmem>>, vector<1x128xi32>
    %8 = vector.broadcast %6 : vector<16x1xi32> to vector<16x128xi32>
    %9 = vector.broadcast %7 : vector<1x128xi32> to vector<16x128xi32>
    %10 = arith.cmpi eq, %8, %9 : vector<16x128xi32>
    %cst_8 = arith.constant 1.000000e+00 : f32
    %cst_9 = arith.constant 9.99999974E-6 : f32
    %11 = arith.subf %cst_8, %cst_9 : f32
    %12 = vector.broadcast %11 : f32 to vector<16x128xf32>
    %13 = arith.cmpf olt, %5, %12 : vector<16x128xf32>
    %cst_10 = arith.constant 1.000000e+00 : f32
    %14 = vector.broadcast %cst_10 : f32 to vector<16x128xf32>
    %15 = arith.subf %14, %5 : vector<16x128xf32>
    %cst_11 = arith.constant 0.000000e+00 : f32
    %16 = vector.broadcast %cst_11 : f32 to vector<16x128xf32>
    %17 = arith.select %13, %15, %16 : vector<16x128xi1>, vector<16x128xf32>
    %cst_12 = arith.constant 5.000000e-01 : f32
    %18 = vector.broadcast %cst_12 : f32 to vector<16x128xf32>
    %19 = arith.cmpf ogt, %5, %18 : vector<16x128xf32>
    %cst_13 = arith.constant 0.000000e+00 : f32
    %20 = vector.broadcast %cst_13 : f32 to vector<16x128xf32>
    %21 = arith.select %19, %5, %20 : vector<16x128xi1>, vector<16x128xf32>
    %22 = arith.select %10, %17, %21 : vector<16x128xi1>, vector<16x128xf32>
    %c16_i32 = arith.constant 16 : i32
    %23 = arith.muli %arg0, %c16_i32 : i32
    %24 = tpu.iota {dimensions = array<i32: 0>} : vector<16x128xi32>
    %25 = vector.broadcast %23 : i32 to vector<16x128xi32>
    %26 = arith.addi %25, %24 : vector<16x128xi32>
    %c128_i32 = arith.constant 128 : i32
    %27 = arith.muli %arg1, %c128_i32 : i32
    %28 = tpu.iota {dimensions = array<i32: 1>} : vector<16x128xi32>
    %29 = vector.broadcast %27 : i32 to vector<16x128xi32>
    %30 = arith.addi %29, %28 : vector<16x128xi32>
    %c16_i32_14 = arith.constant 16 : i32
    %31 = vector.broadcast %c16_i32_14 : i32 to vector<16x128xi32>
    %32 = arith.cmpi slt, %26, %31 : vector<16x128xi32>
    %c32_i32 = arith.constant 32 : i32
    %33 = vector.broadcast %c32_i32 : i32 to vector<16x128xi32>
    %34 = arith.cmpi slt, %30, %33 : vector<16x128xi32>
    %35 = arith.andi %32, %34 : vector<16x128xi1>
    %cst_15 = arith.constant 0.000000e+00 : f32
    %36 = vector.broadcast %cst_15 : f32 to vector<16x128xf32>
    %37 = arith.select %35, %22, %36 : vector<16x128xi1>, vector<16x128xf32>
    %c0_16 = arith.constant 0 : index
    %c0_17 = arith.constant 0 : index
    %38 = vector.load %arg6[%c0_16, %c0_17] : memref<16x128xf32, #tpu.memory_space<vmem>>, vector<16x128xf32>
    %39 = arith.addf %38, %37 : vector<16x128xf32>
    %c0_18 = arith.constant 0 : index
    %c0_19 = arith.constant 0 : index
    %40 = vector.load %arg6[%c0_18, %c0_19] : memref<16x128xf32, #tpu.memory_space<vmem>>, vector<16x128xf32>
    tpu.vector_store %arg6[%c0_18, %c0_19], %39 {strides = array<i32>} : memref<16x128xf32, #tpu.memory_space<vmem>>, vector<16x128xf32>,
    return
  }
  func.func @transform_0(%arg0: i32, %arg1: i32) -> (i32, i32) {
    %c0_i32 = arith.constant 0 : i32
    %c0_i32_0 = arith.constant 0 : i32
    return %arg0, %c0_i32 : i32, i32
  }
  func.func @transform_1(%arg0: i32, %arg1: i32) -> (i32, i32) {
    %c0_i32 = arith.constant 0 : i32
    %c0_i32_0 = arith.constant 0 : i32
    return %arg0, %c0_i32 : i32, i32
  }
  func.func @transform_2(%arg0: i32, %arg1: i32) -> (i32, i32) {
    %c0_i32 = arith.constant 0 : i32
    %c0_i32_0 = arith.constant 0 : i32
    return %arg1, %c0_i32 : i32, i32
  }
  func.func @transform_3(%arg0: i32, %arg1: i32) -> (i32, i32) {
    %c0_i32 = arith.constant 0 : i32
    %c0_i32_0 = arith.constant 0 : i32
    return %c0_i32, %arg1 : i32, i32
  }
  func.func @transform_4(%arg0: i32, %arg1: i32) -> (i32, i32) {
    %c0_i32 = arith.constant 0 : i32
    %c0_i32_0 = arith.constant 0 : i32
    return %arg0, %c0_i32 : i32, i32
  }
}

</mosaic_0001>

<bundles_post_ra>
// kernel: tpu_custom_call.1
= control target key start
LH: loop header
LB: loop body
LE: loop exit
PB: predicated region body
PF: predicated region fallthrough
CT: control target
= control target key end

     0   :  { %9 = vsyncpa [#allocation3], 0  ;;  %s569_s0 = inlined_call_operand.hbm [shape: f32[16,128], index: 0, kind: input, shape index: {}]   ;;  %s570_s1 = inlined_call_operand.hbm [shape: s32[16,1], index: 1, kind: input, shape index: {}]   ;;  %s571_s2 = inlined_call_operand.hbm [shape: f32[128,128], index: 2, kind: input, shape index: {}]   ;;  %s572_s3 = inlined_call_operand.hbm [shape: s32[1,128], index: 3, kind: input, shape index: {}]   ;;  %s573_s4 = inlined_call_operand.hbm [shape: f32[16,128], index: 4, kind: output, shape index: {}]  }
   0x1   :  { %10 = vsyncpa [#allocation6], 0 }
   0x2   :  { %11 = vsyncpa [#allocation9], 0 }
   0x3   :  { %12 = vsyncpa [#allocation4], 0  ;;  %s455_s15 = smov [#allocation5]   ;;  %s456_s17 = smov [#allocation2]  }
   0x4   :  { %s30_s16 = sshll.u32 %s455_s15, 4  ;;  %s18_s18 = sshll.u32 %s456_s17, 4  ;;  %s31_s16 = int_to_ptr.vmem [resolvable:$true] %s30_s16  ;;  %s488_s18 = int_to_ptr.vmem [resolvable:$true] %s18_s18 }
   0x5   :  { %s337_s21 = scalar_lea.hbm %s570_s1, 256 }
   0x6   :  { %p338_p0 = scmp.ne.s32.totalorder %s570_s1, %s337_s21  ;;  %p341_p1 = scmp.lt.u32.totalorder %s337_s21, %s570_s1 }
   0x8   :  { %p343_p2 = pnand %p341_p1, %p338_p0 }
   0xa   :  { %346 = shalt.err (!%p343_p2)
}
   0xb   :  { %s347_s26 = scalar_lea.vmem %s31_s16, 256  ;;  %p352_p4 = scmp.lt.s32.totalorder %s31_s16, %s31_s16 }
   0xc   :  { %p348_p3 = scmp.ne.s32.totalorder %s31_s16, %s347_s26  ;;  %p353_p5 = scmp.lt.s32.totalorder %s347_s26, %s347_s26 }
   0xe   :  { %p354_p6 = por %p353_p5, %p352_p4 }
  0x10   :  { %p355_p7 = pnand %p354_p6, %p348_p3 }
  0x12   :  { %358 = shalt.err (!%p355_p7)
}
  0x13   :  { %s457_s27 = smov 128   ;;  %s458_s28 = smov 8  }
  0x14   :  { %36 = dma.hbm_to_vmem [thread:$0]  %s570_s1, 256, %s31_s16, [#allocation6], %s457_s27, %s457_s27, %s458_s28  }
  0x15   :  { %s359_s7 = scalar_lea.hbm %s569_s0, 256 }
  0x16   :  { %p360_p8 = scmp.ne.s32.totalorder %s569_s0, %s359_s7  ;;  %p363_p9 = scmp.lt.u32.totalorder %s359_s7, %s569_s0 }
  0x18   :  { %p365_p10 = pnand %p363_p9, %p360_p8 }
  0x1a   :  { %368 = shalt.err (!%p365_p10)
}
  0x1b   :  { %s369_s12 = scalar_lea.vmem %s488_s18, 256  ;;  %p374_p12 = scmp.lt.s32.totalorder %s488_s18, %s488_s18 }
  0x1c   :  { %p370_p11 = scmp.ne.s32.totalorder %s488_s18, %s369_s12  ;;  %p375_p13 = scmp.lt.s32.totalorder %s369_s12, %s369_s12 }
  0x1e   :  { %p376_p0 = por %p375_p13, %p374_p12 }
  0x20   :  { %p377_p1 = pnand %p376_p0, %p370_p11 }
  0x22   :  { %380 = shalt.err (!%p377_p1)
}
  0x23   :  { %24 = dma.hbm_to_vmem [thread:$0]  %s569_s0, 256, %s488_s18, [#allocation3], %s457_s27, %s457_s27, %s458_s28  }
  0x24   :  { %s459_s14 = smov [#allocation7]   ;;  %s460_s16 = smov [#allocation8]  }
  0x25   :  { %s42_s15 = sshll.u32 %s459_s14, 4  ;;  %s55_s17 = sshll.u32 %s460_s16, 4  ;;  %s43_s15 = int_to_ptr.vmem [resolvable:$true] %s42_s15  ;;  %s56_s17 = int_to_ptr.vmem [resolvable:$true] %s55_s17 }
  0x26   :  { %s381_s21 = scalar_lea.hbm %s571_s2, 2048 }
  0x27   :  { %p382_p2 = scmp.ne.s32.totalorder %s571_s2, %s381_s21  ;;  %p385_p3 = scmp.lt.u32.totalorder %s381_s21, %s571_s2 }
  0x29   :  { %p387_p4 = pnand %p385_p3, %p382_p2 }
  0x2b   :  { %390 = shalt.err (!%p387_p4)
}
  0x2c   :  { %s391_s0 = scalar_lea.vmem %s43_s15, 2048  ;;  %p396_p6 = scmp.lt.s32.totalorder %s43_s15, %s43_s15 }
  0x2d   :  { %p392_p5 = scmp.ne.s32.totalorder %s43_s15, %s391_s0  ;;  %p397_p7 = scmp.lt.s32.totalorder %s391_s0, %s391_s0 }
  0x2f   :  { %p398_p8 = por %p397_p7, %p396_p6 }
  0x31   :  { %p399_p9 = pnand %p398_p8, %p392_p5 }
  0x33   :  { %402 = shalt.err (!%p399_p9)
}
  0x34   :  { %48 = dma.hbm_to_vmem [thread:$0]  %s571_s2, 2048, %s43_s15, [#allocation6], %s457_s27, %s457_s27, %s458_s28  }
  0x35   :  { %s403_s5 = scalar_lea.hbm %s572_s3, 16 }
  0x36   :  { %p404_p10 = scmp.ne.s32.totalorder %s572_s3, %s403_s5  ;;  %p407_p11 = scmp.lt.u32.totalorder %s403_s5, %s572_s3 }
  0x38   :  { %p409_p12 = pnand %p407_p11, %p404_p10 }
  0x3a   :  { %412 = shalt.err (!%p409_p12)
}
  0x3b   :  { %s413_s10 = scalar_lea.vmem %s56_s17, 16  ;;  %s417_s11 = scalar_lea.vmem %s56_s17, 32 }
  0x3c   :  { %p414_p13 = scmp.ne.s32.totalorder %s56_s17, %s413_s10  ;;  %p418_p0 = scmp.lt.s32.totalorder %s56_s17, %s56_s17 }
  0x3d   :  { %p419_p1 = scmp.lt.s32.totalorder %s417_s11, %s413_s10 }
  0x3f   :  { %p420_p2 = por %p419_p1, %p418_p0 }
  0x41   :  { %p421_p3 = pnand %p420_p2, %p414_p13 }
  0x43   :  { %424 = shalt.err (!%p421_p3)
}
  0x44   :  { %58 = dma.hbm_to_vmem [thread:$0]  %s572_s3, 16, %s56_s17, [#allocation9]  }
  0x45   :  { %447 = dma.done.wait [#allocation3], 256  }
  0x46   :  { %448 = vsyncadd [#allocation3], 4294967040 }
  0x47   :  { %449 = dma.done.wait [#allocation6], 2304  }
  0x48   :  { %450 = vsyncadd [#allocation6], 4294964992 }
  0x49   :  { %451 = dma.done.wait [#allocation9], 16  }
  0x4a   :  { %452 = vsyncadd [#allocation9], 4294967280  ;;  %v461_v0 = vmov 0   ;;  %v79_v1 = vld [vmem:[#allocation7] sm:$0xff]  ;;  %v80_v2 = vld [vmem:[#allocation7 + $0x8] sm:$0xff]  ;;  %v205_v29 = vlaneseq  ;;  %s462_s3 = smov [#allocation10]  }
  0x4b   :  { %336 = vset.pattern.permute.xlu0 %v461_v0  ;;  %v81_v3 = vld [vmem:[#allocation7 + $0x10] sm:$0xff]  ;;  %v295_v4 = vpack.c.bf16 %v80_v2, %v79_v1  ;;  %v82_v5 = vld [vmem:[#allocation7 + $0x18] sm:$0xff]  ;;  %v77_v7 = vld [vmem:[#allocation2] sm:$0xff]  ;;  %s227_s1 = sshll.u32 %s462_s3, 4  ;;  %s228_s1 = int_to_ptr.vmem [resolvable:$true] %s227_s1 }
  0x4c   :  { %v299_v6 = vpack.c.bf16 %v82_v5, %v81_v3  ;;  %v83_v8 = vld [vmem:[#allocation7 + $0x20] sm:$0xff]  ;;  %v84_v9 = vld [vmem:[#allocation7 + $0x28] sm:$0xff]  ;;  %292 = vmatprep.mubr.f32.mxu0 %v77_v7  ;;  %v170_v10 = vld [vmem:[#allocation5] sm:$0xff]  ;;  %v206_v31 = vand.u32 127, %v205_v29  ;;  %s425_s13 = scalar_lea.vmem %s228_s1, 256  ;;  %p430_p5 = scmp.lt.s32.totalorder %s228_s1, %s228_s1 }
  0x4d   :  { %296 = vmatprep.subr.bf16.mxu0 %v295_v4  ;;  %174 = vperm.xlu0 %336, %v170_v10   ;;  %v171_v11 = vld [vmem:[#allocation5 + $0x8] sm:$0xff]  ;;  %v303_v12 = vpack.c.bf16 %v84_v9, %v83_v8  ;;  %v85_v13 = vld [vmem:[#allocation7 + $0x30] sm:$0xff]  ;;  %v87_v16 = vld [vmem:[#allocation7 + $0x40] sm:$0xff]  ;;  %p426_p4 = scmp.ne.s32.totalorder %s228_s1, %s425_s13  ;;  %p431_p6 = scmp.lt.s32.totalorder %s425_s13, %s425_s13 }
  0x4e   :  { %298 = vmatpush3.bf16.xpose.msra.mxu0 %v295_v4  ;;  %v86_v14 = vld [vmem:[#allocation7 + $0x38] sm:$0xff]  ;;  %v88_v17 = vld [vmem:[#allocation7 + $0x48] sm:$0xff]  ;;  %v89_v19 = vld [vmem:[#allocation7 + $0x50] sm:$0xff]  ;;  %vm211_vm0 = vcmp.lt.s32.totalorder %v206_v31, 32 }
  0x4f   :  { %300 = vmatprep.subr.bf16.mxu0 %v299_v6  ;;  %v307_v15 = vpack.c.bf16 %v86_v14, %v85_v13  ;;  %v311_v18 = vpack.c.bf16 %v88_v17, %v87_v16  ;;  %v90_v20 = vld [vmem:[#allocation7 + $0x58] sm:$0xff]  ;;  %v91_v22 = vld [vmem:[#allocation7 + $0x60] sm:$0xff]  ;;  %v92_v23 = vld [vmem:[#allocation7 + $0x68] sm:$0xff]  ;;  %p432_p7 = por %p431_p6, %p430_p5 }
  0x50   :  { %v315_v21 = vpack.c.bf16 %v90_v20, %v89_v19  ;;  %v319_v24 = vpack.c.bf16 %v92_v23, %v91_v22  ;;  %v93_v25 = vld [vmem:[#allocation7 + $0x70] sm:$0xff]  ;;  %v94_v26 = vld [vmem:[#allocation7 + $0x78] sm:$0xff]  ;;  %v78_v28 = vld [vmem:[#allocation2 + $0x8] sm:$0xff] }
  0x51   :  { %177 = vperm.xlu0 %336, %v171_v11   ;;  %v323_v27 = vpack.c.bf16 %v94_v26, %v93_v25  ;;  %v241_v32 = vld [vmem:[#allocation8] ss:$0 sm:$0xff]  ;;  %p433_p8 = pnand %p432_p7, %p426_p4 }
  0x56   :  { %302 = vmatpush3.bf16.xpose.msra.mxu0 %v299_v6 }
  0x57   :  { %304 = vmatprep.subr.bf16.mxu0 %v303_v12 }
  0x5e   :  { %306 = vmatpush3.bf16.xpose.msra.mxu0 %v303_v12 }
  0x5f   :  { %308 = vmatprep.subr.bf16.mxu0 %v307_v15 }
  0x66   :  { %310 = vmatpush3.bf16.xpose.msra.mxu0 %v307_v15 }
  0x67   :  { %312 = vmatprep.subr.bf16.mxu0 %v311_v18 }
  0x6e   :  { %314 = vmatpush3.bf16.xpose.msra.mxu0 %v311_v18 }
  0x6f   :  { %316 = vmatprep.subr.bf16.mxu0 %v315_v21 }
  0x76   :  { %318 = vmatpush3.bf16.xpose.msra.mxu0 %v315_v21 }
  0x77   :  { %320 = vmatprep.subr.bf16.mxu0 %v319_v24 }
  0x7e   :  { %322 = vmatpush3.bf16.xpose.msra.mxu0 %v319_v24 }
  0x7f   :  { %324 = vmatprep.subr.bf16.mxu0 %v323_v27 }
  0x86   :  { %326 = vmatpush3.bf16.xpose.msra.mxu0 %v323_v27 }
  0x8d   :  { %293 = vmatmul.mubr.f32.vlgmr.msra.gmra.mrb[0].mxu0 %v78_v28 }
  0xcc   :  { %v175_v30 = vpop.permute.xlu0 %174 }
  0xcd   :  { %vm183_vm6 = vcmp.eq.s32.totalorder %v175_v30, %v241_v32 }
  0xd0   :  { %v178_v33 = vpop.permute.xlu0 %177 }
  0xd1   :  { %vm184_vm5 = vcmp.eq.s32.totalorder %v178_v33, %v241_v32 }
 0x160   :  { %v294_v34 = vpop.f32.mrb[0].mxu0 }
 0x161   :  { %vm186_vm1 = vcmp.lt.f32.partialorder %v294_v34, 0.99999  ;;  %v188_v35 = vsub.f32 1.0, %v294_v34  ;;  %vm192_vm2 = vcmp.gt.f32.partialorder %v294_v34, 0.5  ;;  %v161_v36 = vpop.f32.mrb[1].mxu0 }
 0x162   :  { %v194_v37 = vsel %vm192_vm2, %v294_v34, 0.0  ;;  %vm185_vm3 = vcmp.lt.f32.partialorder %v161_v36, 0.99999  ;;  %v187_v38 = vsub.f32 1.0, %v161_v36  ;;  %vm191_vm4 = vcmp.gt.f32.partialorder %v161_v36, 0.5 }
 0x163   :  { %v190_v39 = vsel %vm186_vm1, %v188_v35, 0.0  ;;  %v193_v40 = vsel %vm191_vm4, %v161_v36, 0.0 }
 0x164   :  { %v196_v41 = vsel %vm184_vm5, %v190_v39, %v194_v37  ;;  %v189_v42 = vsel %vm185_vm3, %v187_v38, 0.0 }
 0x165   :  { %v195_v43 = vsel %vm183_vm6, %v189_v42, %v193_v40  ;;  %v215_v44 = vsel %vm211_vm0, %v196_v41, 0.0 }
 0x166   :  { %v214_v45 = vsel %vm211_vm0, %v195_v43, 0.0  ;;  %221 = vst [vmem:[#allocation10 + $0x8] sm:$0xff] %v215_v44 }
 0x167   :  { %220 = vst [vmem:[#allocation10] sm:$0xff] %v214_v45 }
 0x168   :  { %436 = shalt.err (!%p433_p8)
}
 0x169   :  { %s437_s16 = scalar_lea.hbm %s573_s4, 256 }
 0x16a   :  { %p438_p9 = scmp.ne.s32.totalorder %s573_s4, %s437_s16  ;;  %p441_p10 = scmp.lt.u32.totalorder %s437_s16, %s573_s4 }
 0x16c   :  { %p443_p11 = pnand %p441_p10, %p438_p9 }
 0x16e   :  { %446 = shalt.err (!%p443_p11)
}
 0x16f   :  { %233 = dma.vmem_to_hbm [thread:$0]  %s228_s1, 256, %s573_s4, [#allocation4], %s457_s27, %s457_s27, %s458_s28  }
 0x170   :  { %453 = dma.done.wait [#allocation4], 256  }
 0x171   :  { %454 = vsyncadd [#allocation4], 4294967040 }
 0x172   :  { %237 = vsyncpa [#allocation3], 1 }
 0x173   :  { %238 = vsyncpa [#allocation6], 1 }
 0x174   :  { %239 = vsyncpa [#allocation9], 1 }
 0x175   :  { %240 = vsyncpa [#allocation4], 1 }

</bundles_post_ra>
